<compile_context>
chip_gen: v7x
topology: tpu7x:2x2x1
jax: 0.10.0
libtpu: 0.0.40
codegen_flags: <defaults>
</compile_context>

<pallas_src>
import functools

import jax
import jax.numpy as jnp
from jax import lax
from jax.experimental import pallas as pl
from jax.experimental.pallas import tpu as pltpu


_LANE = 128
_SUBLANE = 8
_MAX_TIME_CHUNK = 32                      # >= 32 per perf review (v6e/v7x)
_VMEM_BUDGET_BYTES = 48 * 1024 * 1024     # conservative across v5e/v6e/v7x


def _round_up(n, m):
    return ((n + m - 1) // m) * m


def _rnn_recurrence_kernel(xp_ref, whh_t_ref, out_ref, h_scratch, *, unroll):
    """One grid step = one (batch block, time chunk) of the Elman recurrence.

    xp_ref:    (TL, BB, Hp)  pre-projected x @ W_ih^T chunk (compute dtype)
    whh_t_ref: (Hp, Hp)      W_hh^T, grid-invariant, resident in VMEM
    out_ref:   (TL, BB, Hp)  hidden state for every step of this chunk
    h_scratch: (BB, Hp) f32  hidden state carried across time chunks
    """
    # Time axis (grid axis 1) restarts at 0 for every batch block.
    @pl.when(pl.program_id(1) == 0)
    def _():
        h_scratch[...] = jnp.zeros_like(h_scratch)

    tl = xp_ref.shape[0]
    w_hh_t = whh_t_ref[...]          # loaded once per chunk (loop-invariant)

    def step(i, h):
        # Recurrent matmul on the MXU with f32 accumulation; xp streamed from
        # VMEM one step at a time (no chunk-wide vreg residency).
        z = xp_ref[i].astype(jnp.float32) + jnp.dot(
            h.astype(w_hh_t.dtype), w_hh_t, preferred_element_type=jnp.float32
        )
        h_new = jnp.tanh(z)
        out_ref[i] = h_new.astype(out_ref.dtype)
        return h_new

    h = h_scratch[...]
    if unroll >= tl:
        # Short chunk: full static unroll.
        for i in range(tl):
            h = step(i, h)
    else:
        # Long chunk: lightly unrolled fori_loop keeps the live set to one
        # (BB, Hp) tile of h while keeping scheduler visibility.
        h = lax.fori_loop(0, tl, step, h, unroll=unroll)

    h_scratch[...] = h


@functools.partial(jax.jit, static_argnames=("compute_dtype",))
def torch_rnn_forward(x, w_ih, w_hh, *, compute_dtype=jnp.bfloat16):
    """Equivalent of TorchRNN.forward (nn.RNN, bias=False, batch_first=True).

    Args:
      x:    (B, L, I) float32
      w_ih: (H, I)    float32   (weight_ih_l0)
      w_hh: (H, H)    float32   (weight_hh_l0)
    Returns:
      output: (B, L, H) float32, h_n: (1, B, H) float32
    """
    B, L, I = x.shape
    H = w_ih.shape[0]
    cd = jnp.dtype(compute_dtype)
    itemsize = cd.itemsize

    # Lane/sublane-aligned padded sizes (native tiles even for bf16: 16x128).
    sub = _SUBLANE * (4 // itemsize)
    bp = _round_up(B, sub)
    hp = _round_up(H, _LANE)

    # Batch block: split large batches so v7x's 2 TensorCores get independent
    # sequences via the "parallel" grid axis.
    bb = min(bp, 64)
    bp = _round_up(bp, bb)
    nb = bp // bb

    # Time chunk bounded by a conservative resident-VMEM budget
    # (double-buffered in/out chunks + double-buffered weights + scratch).
    weight_vmem = 2 * hp * hp * itemsize
    scratch_vmem = bb * hp * 4
    per_step_vmem = 4 * bb * hp * itemsize           # in + out, double-buffered
    tl_cap = max(1, (_VMEM_BUDGET_BYTES - weight_vmem - scratch_vmem) // per_step_vmem)
    tl = int(min(_MAX_TIME_CHUNK, L, tl_cap))
    lp = _round_up(L, tl)
    nt = lp // tl

    # ---- Wrapper-side, time-parallel input projection (one XLA matmul). ----
    x_tm = jnp.transpose(x, (1, 0, 2))                                  # (L, B, I)
    xp = jnp.einsum(
        "lbi,hi->lbh",
        x_tm.astype(cd), w_ih.astype(cd),
        preferred_element_type=jnp.float32,
    ).astype(cd)                                                        # (L, B, H)
    xp_p = jnp.pad(xp, ((0, lp - L), (0, bp - B), (0, hp - H)))         # (Lp, Bp, Hp)

    # Pre-transposed, zero-padded recurrent weight (padded rows/cols are zero,
    # so padded batch rows / hidden cols stay exactly zero through tanh(0)=0).
    w_hh_t = jnp.pad(w_hh.T.astype(cd), ((0, hp - H), (0, hp - H)))     # (Hp, Hp)

    unroll = tl if tl <= 8 else 4
    vmem_needed = weight_vmem + scratch_vmem + per_step_vmem * tl
    vmem_limit = int(min(max(2 * vmem_needed, 32 * 1024 * 1024), 128 * 1024 * 1024))

    out_p = pl.pallas_call(
        functools.partial(_rnn_recurrence_kernel, unroll=unroll),
        out_shape=jax.ShapeDtypeStruct((lp, bp, hp), cd),
        grid_spec=pltpu.PrefetchScalarGridSpec(
            num_scalar_prefetch=0,
            grid=(nb, nt),
            in_specs=[
                pl.BlockSpec((tl, bb, hp), lambda b, t: (t, b, 0)),   # xp chunk
                pl.BlockSpec((hp, hp), lambda b, t: (0, 0)),          # W_hh^T (resident)
            ],
            out_specs=pl.BlockSpec((tl, bb, hp), lambda b, t: (t, b, 0)),
            scratch_shapes=[pltpu.VMEM((bb, hp), jnp.float32)],       # carried h (f32)
        ),
        compiler_params=pltpu.CompilerParams(
            dimension_semantics=("parallel", "arbitrary"),
            vmem_limit_bytes=vmem_limit,
        ),
    )(xp_p, w_hh_t)

    out_tm = out_p[:L, :B, :H].astype(jnp.float32)    # strip padding, back to f32
    output = jnp.transpose(out_tm, (1, 0, 2))         # batch_first (B, L, H)
    h_n = out_tm[L - 1][None]                         # (1, B, H) from last valid step
    return output, h_n


def _reference_rnn(x, w_ih, w_hh):
    """Pure-JAX f32 reference mirroring nn.RNN(bias=False, batch_first=True)."""
    x_tm = jnp.transpose(x, (1, 0, 2)).astype(jnp.float32)

    def step(h, x_t):
        h_new = jnp.tanh(x_t @ w_ih.T + h @ w_hh.T)
        return h_new, h_new

    h0 = jnp.zeros((x.shape[0], w_hh.shape[0]), jnp.float32)
    h_last, outs = jax.lax.scan(step, h0, x_tm)
    return jnp.transpose(outs, (1, 0, 2)), h_last[None]


if __name__ == "__main__":
    root = jax.random.PRNGKey(0)
    key_small, key_big = jax.random.split(root, 2)

    def make_inputs(key, B, L, I, H, hh_scale=1.0):
        kx, kih, khh = jax.random.split(key, 3)
        x = jax.random.normal(kx, (B, L, I), dtype=jnp.float32)
        bound = 1.0 / (H ** 0.5)
        w_ih = jax.random.uniform(kih, (H, I), jnp.float32, -bound, bound)
        w_hh = jax.random.uniform(khh, (H, H), jnp.float32,
                                  -bound * hh_scale, bound * hh_scale)
        return x, w_ih, w_hh

    # --- Spec shapes: batch=2, seq_len=5, input_size=3, hidden_size=4 ---
    x, w_ih, w_hh = make_inputs(key_small, B=2, L=5, I=3, H=4)
    ref_out, ref_hn = _reference_rnn(x, w_ih, w_hh)

    # Exact-mode check (float32 end to end).
    out32, hn32 = torch_rnn_forward(x, w_ih, w_hh, compute_dtype=jnp.float32)
    jax.block_until_ready((out32, hn32))
    assert out32.shape == (2, 5, 4) and hn32.shape == (1, 2, 4)
    assert jnp.allclose(out32, ref_out, atol=1e-4, rtol=1e-4)
    assert jnp.allclose(hn32, ref_hn, atol=1e-4, rtol=1e-4)

    # Default bf16-compute path (per perf review), looser tolerance vs f32 ref.
    out16, hn16 = torch_rnn_forward(x, w_ih, w_hh)
    jax.block_until_ready((out16, hn16))
    assert out16.shape == (2, 5, 4) and hn16.shape == (1, 2, 4)
    assert jnp.allclose(out16, ref_out, atol=6e-2, rtol=6e-2)
    assert jnp.allclose(hn16, ref_hn, atol=6e-2, rtol=6e-2)

    # --- Larger shapes exercising multi-chunk time, multiple batch blocks and
    #     the fori_loop path (contractive W_hh keeps bf16 error bounded). ---
    x2, w_ih2, w_hh2 = make_inputs(key_big, B=80, L=40, I=8, H=32, hh_scale=0.3)
    ref_out2, ref_hn2 = _reference_rnn(x2, w_ih2, w_hh2)

    out32b, hn32b = torch_rnn_forward(x2, w_ih2, w_hh2, compute_dtype=jnp.float32)
    jax.block_until_ready((out32b, hn32b))
    assert jnp.allclose(out32b, ref_out2, atol=5e-4, rtol=5e-4)
    assert jnp.allclose(hn32b, ref_hn2, atol=5e-4, rtol=5e-4)

    out16b, hn16b = torch_rnn_forward(x2, w_ih2, w_hh2)
    jax.block_until_ready((out16b, hn16b))
    assert jnp.allclose(out16b, ref_out2, atol=6e-2, rtol=6e-2)
    assert jnp.allclose(hn16b, ref_hn2, atol=6e-2, rtol=6e-2)

    print("KERNEL_OK")
</pallas_src>

<mosaic_0001>
module attributes {stable_mosaic.version = 11 : i64} {
  func.func @_rnn_recurrence_kernel(%arg0: i32, %arg1: i32, %arg2: memref<5x8x128xf32, #tpu.memory_space<vmem>>, %arg3: memref<128x128xf32, #tpu.memory_space<vmem>>, %arg4: memref<5x8x128xf32, #tpu.memory_space<vmem>>, %arg5: memref<8x128xf32, #tpu.memory_space<vmem>>) attributes {dimension_semantics = [#tpu.dimension_semantics<parallel>, #tpu.dimension_semantics<arbitrary>], iteration_bounds = array<i64: 1, 1>, scalar_prefetch = 0 : i64, scratch_operands = 1 : i64, tpu.core_type = #tpu.core_type<tc>, window_params = [{transform_indices = @transform_0, window_bounds = array<i64: 5, 8, 128>}, {pipeline_mode = #tpu.pipeline_mode<synchronous>, transform_indices = @transform_1, window_bounds = array<i64: 128, 128>}, {transform_indices = @transform_2, window_bounds = array<i64: 5, 8, 128>}]} {
    %c0_i32 = arith.constant 0 : i32
    %0 = arith.cmpi eq, %arg1, %c0_i32 : i32
    %1 = arith.extui %0 : i1 to i32
    %c0_i32_0 = arith.constant 0 : i32
    %2 = arith.cmpi ne, %1, %c0_i32_0 : i32
    scf.if %2 {
      %cst_36 = arith.constant 0.000000e+00 : f32
      %46 = vector.broadcast %cst_36 : f32 to vector<8x128xf32>
      %c0_37 = arith.constant 0 : index
      %c0_38 = arith.constant 0 : index
      %47 = vector.load %arg5[%c0_37, %c0_38] : memref<8x128xf32, #tpu.memory_space<vmem>>, vector<8x128xf32>
      tpu.vector_store %arg5[%c0_37, %c0_38], %46 {strides = array<i32>} : memref<8x128xf32, #tpu.memory_space<vmem>>, vector<8x128xf32>,
    } else {
    }
    %c0 = arith.constant 0 : index
    %c0_1 = arith.constant 0 : index
    %3 = vector.load %arg3[%c0, %c0_1] : memref<128x128xf32, #tpu.memory_space<vmem>>, vector<128x128xf32>
    %c0_2 = arith.constant 0 : index
    %c0_3 = arith.constant 0 : index
    %4 = vector.load %arg5[%c0_2, %c0_3] : memref<8x128xf32, #tpu.memory_space<vmem>>, vector<8x128xf32>
    %c0_4 = arith.constant 0 : index
    %c0_5 = arith.constant 0 : index
    %c0_6 = arith.constant 0 : index
    %5 = vector.load %arg2[%c0_4, %c0_5, %c0_6] : memref<5x8x128xf32, #tpu.memory_space<vmem>>, vector<1x8x128xf32>
    %6 = vector.shape_cast %5 : vector<1x8x128xf32> to vector<8x128xf32>
    %cst = arith.constant dense<0.000000e+00> : vector<8x128xf32>
    %7 = tpu.matmul %4, %3, %cst {dimension_numbers = #tpu.dot_dimension_numbers<[1], [0], [0], [1], [0, 0, 1, 1], [], []>} : vector<8x128xf32>, vector<128x128xf32>, vector<8x128xf32> -> vector<8x128xf32>
    %8 = arith.addf %6, %7 : vector<8x128xf32>
    %9 = math.tanh %8 : vector<8x128xf32>
    %c0_7 = arith.constant 0 : index
    %c0_8 = arith.constant 0 : index
    %c0_9 = arith.constant 0 : index
    %10 = vector.load %arg4[%c0_7, %c0_8, %c0_9] : memref<5x8x128xf32, #tpu.memory_space<vmem>>, vector<1x8x128xf32>
    %11 = vector.shape_cast %10 : vector<1x8x128xf32> to vector<8x128xf32>
    %12 = vector.shape_cast %9 : vector<8x128xf32> to vector<1x8x128xf32>
    tpu.vector_store %arg4[%c0_7, %c0_8, %c0_9], %12 {strides = array<i32>} : memref<5x8x128xf32, #tpu.memory_space<vmem>>, vector<1x8x128xf32>,
    %c1 = arith.constant 1 : index
    %c0_10 = arith.constant 0 : index
    %c0_11 = arith.constant 0 : index
    %13 = vector.load %arg2[%c1, %c0_10, %c0_11] : memref<5x8x128xf32, #tpu.memory_space<vmem>>, vector<1x8x128xf32>
    %14 = vector.shape_cast %13 : vector<1x8x128xf32> to vector<8x128xf32>
    %cst_12 = arith.constant dense<0.000000e+00> : vector<8x128xf32>
    %15 = tpu.matmul %9, %3, %cst_12 {dimension_numbers = #tpu.dot_dimension_numbers<[1], [0], [0], [1], [0, 0, 1, 1], [], []>} : vector<8x128xf32>, vector<128x128xf32>, vector<8x128xf32> -> vector<8x128xf32>
    %16 = arith.addf %14, %15 : vector<8x128xf32>
    %17 = math.tanh %16 : vector<8x128xf32>
    %c1_13 = arith.constant 1 : index
    %c0_14 = arith.constant 0 : index
    %c0_15 = arith.constant 0 : index
    %18 = vector.load %arg4[%c1_13, %c0_14, %c0_15] : memref<5x8x128xf32, #tpu.memory_space<vmem>>, vector<1x8x128xf32>
    %19 = vector.shape_cast %18 : vector<1x8x128xf32> to vector<8x128xf32>
    %20 = vector.shape_cast %17 : vector<8x128xf32> to vector<1x8x128xf32>
    tpu.vector_store %arg4[%c1_13, %c0_14, %c0_15], %20 {strides = array<i32>} : memref<5x8x128xf32, #tpu.memory_space<vmem>>, vector<1x8x128xf32>,
    %c2 = arith.constant 2 : index
    %c0_16 = arith.constant 0 : index
    %c0_17 = arith.constant 0 : index
    %21 = vector.load %arg2[%c2, %c0_16, %c0_17] : memref<5x8x128xf32, #tpu.memory_space<vmem>>, vector<1x8x128xf32>
    %22 = vector.shape_cast %21 : vector<1x8x128xf32> to vector<8x128xf32>
    %cst_18 = arith.constant dense<0.000000e+00> : vector<8x128xf32>
    %23 = tpu.matmul %17, %3, %cst_18 {dimension_numbers = #tpu.dot_dimension_numbers<[1], [0], [0], [1], [0, 0, 1, 1], [], []>} : vector<8x128xf32>, vector<128x128xf32>, vector<8x128xf32> -> vector<8x128xf32>
    %24 = arith.addf %22, %23 : vector<8x128xf32>
    %25 = math.tanh %24 : vector<8x128xf32>
    %c2_19 = arith.constant 2 : index
    %c0_20 = arith.constant 0 : index
    %c0_21 = arith.constant 0 : index
    %26 = vector.load %arg4[%c2_19, %c0_20, %c0_21] : memref<5x8x128xf32, #tpu.memory_space<vmem>>, vector<1x8x128xf32>
    %27 = vector.shape_cast %26 : vector<1x8x128xf32> to vector<8x128xf32>
    %28 = vector.shape_cast %25 : vector<8x128xf32> to vector<1x8x128xf32>
    tpu.vector_store %arg4[%c2_19, %c0_20, %c0_21], %28 {strides = array<i32>} : memref<5x8x128xf32, #tpu.memory_space<vmem>>, vector<1x8x128xf32>,
    %c3 = arith.constant 3 : index
    %c0_22 = arith.constant 0 : index
    %c0_23 = arith.constant 0 : index
    %29 = vector.load %arg2[%c3, %c0_22, %c0_23] : memref<5x8x128xf32, #tpu.memory_space<vmem>>, vector<1x8x128xf32>
    %30 = vector.shape_cast %29 : vector<1x8x128xf32> to vector<8x128xf32>
    %cst_24 = arith.constant dense<0.000000e+00> : vector<8x128xf32>
    %31 = tpu.matmul %25, %3, %cst_24 {dimension_numbers = #tpu.dot_dimension_numbers<[1], [0], [0], [1], [0, 0, 1, 1], [], []>} : vector<8x128xf32>, vector<128x128xf32>, vector<8x128xf32> -> vector<8x128xf32>
    %32 = arith.addf %30, %31 : vector<8x128xf32>
    %33 = math.tanh %32 : vector<8x128xf32>
    %c3_25 = arith.constant 3 : index
    %c0_26 = arith.constant 0 : index
    %c0_27 = arith.constant 0 : index
    %34 = vector.load %arg4[%c3_25, %c0_26, %c0_27] : memref<5x8x128xf32, #tpu.memory_space<vmem>>, vector<1x8x128xf32>
    %35 = vector.shape_cast %34 : vector<1x8x128xf32> to vector<8x128xf32>
    %36 = vector.shape_cast %33 : vector<8x128xf32> to vector<1x8x128xf32>
    tpu.vector_store %arg4[%c3_25, %c0_26, %c0_27], %36 {strides = array<i32>} : memref<5x8x128xf32, #tpu.memory_space<vmem>>, vector<1x8x128xf32>,
    %c4 = arith.constant 4 : index
    %c0_28 = arith.constant 0 : index
    %c0_29 = arith.constant 0 : index
    %37 = vector.load %arg2[%c4, %c0_28, %c0_29] : memref<5x8x128xf32, #tpu.memory_space<vmem>>, vector<1x8x128xf32>
    %38 = vector.shape_cast %37 : vector<1x8x128xf32> to vector<8x128xf32>
    %cst_30 = arith.constant dense<0.000000e+00> : vector<8x128xf32>
    %39 = tpu.matmul %33, %3, %cst_30 {dimension_numbers = #tpu.dot_dimension_numbers<[1], [0], [0], [1], [0, 0, 1, 1], [], []>} : vector<8x128xf32>, vector<128x128xf32>, vector<8x128xf32> -> vector<8x128xf32>
    %40 = arith.addf %38, %39 : vector<8x128xf32>
    %41 = math.tanh %40 : vector<8x128xf32>
    %c4_31 = arith.constant 4 : index
    %c0_32 = arith.constant 0 : index
    %c0_33 = arith.constant 0 : index
    %42 = vector.load %arg4[%c4_31, %c0_32, %c0_33] : memref<5x8x128xf32, #tpu.memory_space<vmem>>, vector<1x8x128xf32>
    %43 = vector.shape_cast %42 : vector<1x8x128xf32> to vector<8x128xf32>
    %44 = vector.shape_cast %41 : vector<8x128xf32> to vector<1x8x128xf32>
    tpu.vector_store %arg4[%c4_31, %c0_32, %c0_33], %44 {strides = array<i32>} : memref<5x8x128xf32, #tpu.memory_space<vmem>>, vector<1x8x128xf32>,
    %c0_34 = arith.constant 0 : index
    %c0_35 = arith.constant 0 : index
    %45 = vector.load %arg5[%c0_34, %c0_35] : memref<8x128xf32, #tpu.memory_space<vmem>>, vector<8x128xf32>
    tpu.vector_store %arg5[%c0_34, %c0_35], %41 {strides = array<i32>} : memref<8x128xf32, #tpu.memory_space<vmem>>, vector<8x128xf32>,
    return
  }
  func.func @transform_0(%arg0: i32, %arg1: i32) -> (i32, i32, i32) {
    %c0_i32 = arith.constant 0 : i32
    %c0_i32_0 = arith.constant 0 : i32
    return %arg1, %arg0, %c0_i32 : i32, i32, i32
  }
  func.func @transform_1(%arg0: i32, %arg1: i32) -> (i32, i32) {
    %c0_i32 = arith.constant 0 : i32
    %c0_i32_0 = arith.constant 0 : i32
    %c0_i32_1 = arith.constant 0 : i32
    return %c0_i32, %c0_i32_0 : i32, i32
  }
  func.func @transform_2(%arg0: i32, %arg1: i32) -> (i32, i32, i32) {
    %c0_i32 = arith.constant 0 : i32
    %c0_i32_0 = arith.constant 0 : i32
    return %arg1, %arg0, %c0_i32 : i32, i32, i32
  }
}

</mosaic_0001>

<bundles_post_ra>
// kernel: torch_rnn_forward.1
= control target key start
LH: loop header
LB: loop body
LE: loop exit
PB: predicated region body
PF: predicated region fallthrough
CT: control target
= control target key end

     0   :  { %v817_v0 = vmov 0.0|0.0   ;;  %vm818_vm0 = vmmov 0   ;;  %v819_v4 = vmov 0.0   ;;  %s1020_s1 = inlined_call_operand.vmem [shape: f32[128,128], index: 1, kind: input, shape index: {}]   ;;  %s1021_s0 = inlined_call_operand.vmem [shape: f32[5,8,128], index: 0, kind: input, shape index: {}]   ;;  %s1022_s2 = inlined_call_operand.vmem [shape: f32[5,8,128], index: 2, kind: output, shape index: {}]  }
   0x1   :  { %684 = vmatprep.subr.bf16.mxu0 %v817_v0  ;;  %v16_v1 = vld [vmem:[%s1020_s1] sm:$0xff]  ;;  %v17_v2 = vld [vmem:[%s1020_s1 + $0x8] sm:$0xff]  ;;  %v18_v3 = vld [vmem:[%s1020_s1 + $0x10] sm:$0xff]  ;;  %541 = vmatprep.mubr.msk.f32.mxu0 %vm818_vm0, %v819_v4 }
   0x2   :  { %v847_v5 = vpack.c.bf16 %v17_v2, %v16_v1  ;;  %v19_v6 = vld [vmem:[%s1020_s1 + $0x18] sm:$0xff]  ;;  %708 = vmatprep.subr.bf16.mxu1 %v817_v0  ;;  %576 = vmatprep.mubr.msk.f32.mxu1 %vm818_vm0, %v819_v4  ;;  %v20_v8 = vld [vmem:[%s1020_s1 + $0x20] sm:$0xff]  ;;  %v21_v9 = vld [vmem:[%s1020_s1 + $0x28] sm:$0xff] }
   0x3   :  { %v856_v7 = vpack.c.bf16 %v19_v6, %v18_v3  ;;  %v868_v10 = vpack.c.bf16 %v21_v9, %v20_v8  ;;  %v22_v11 = vld [vmem:[%s1020_s1 + $0x30] sm:$0xff]  ;;  %v23_v12 = vld [vmem:[%s1020_s1 + $0x38] sm:$0xff]  ;;  %v24_v14 = vld [vmem:[%s1020_s1 + $0x40] sm:$0xff] }
   0x4   :  { %686 = vmatpush3.bf16.msra.mxu0 %v847_v5  ;;  %710 = vmatpush3.bf16.msra.mxu1 %v847_v5  ;;  %v880_v13 = vpack.c.bf16 %v23_v12, %v22_v11  ;;  %v25_v15 = vld [vmem:[%s1020_s1 + $0x48] sm:$0xff]  ;;  %v26_v17 = vld [vmem:[%s1020_s1 + $0x50] sm:$0xff]  ;;  %v27_v18 = vld [vmem:[%s1020_s1 + $0x58] sm:$0xff] }
   0x5   :  { %687 = vmatprep.subr.bf16.mxu0 %v817_v0  ;;  %711 = vmatprep.subr.bf16.mxu1 %v817_v0  ;;  %v892_v16 = vpack.c.bf16 %v25_v15, %v24_v14  ;;  %v904_v19 = vpack.c.bf16 %v27_v18, %v26_v17  ;;  %v28_v20 = vld [vmem:[%s1020_s1 + $0x60] sm:$0xff]  ;;  %v29_v21 = vld [vmem:[%s1020_s1 + $0x68] sm:$0xff]  ;;  %v30_v23 = vld [vmem:[%s1020_s1 + $0x70] sm:$0xff] }
   0x6   :  { %v916_v22 = vpack.c.bf16 %v29_v21, %v28_v20  ;;  %v31_v24 = vld [vmem:[%s1020_s1 + $0x78] sm:$0xff]  ;;  %v33_v26 = vld [vmem:[%s1021_s0] sm:$0xff]  ;;  %v416_v31 = vld [vmem:[%s1021_s0 + $0x8] sm:$0xff] }
   0x7   :  { %v928_v25 = vpack.c.bf16 %v31_v24, %v30_v23  ;;  %v418_v36 = vld [vmem:[%s1021_s0 + $0x10] sm:$0xff]  ;;  %v420_v41 = vld [vmem:[%s1021_s0 + $0x18] sm:$0xff]  ;;  %v422_v46 = vld [vmem:[%s1021_s0 + $0x20] sm:$0xff] }
   0x8   :  { %689 = vmatpush3.bf16.msra.mxu0 %v856_v7  ;;  %713 = vmatpush3.bf16.msra.mxu1 %v856_v7 }
   0x9   :  { %690 = vmatprep.subr.bf16.mxu0 %v817_v0  ;;  %714 = vmatprep.subr.bf16.mxu1 %v817_v0 }
   0xc   :  { %692 = vmatpush3.bf16.msra.mxu0 %v868_v10  ;;  %716 = vmatpush3.bf16.msra.mxu1 %v868_v10 }
   0xd   :  { %693 = vmatprep.subr.bf16.mxu0 %v817_v0  ;;  %717 = vmatprep.subr.bf16.mxu1 %v817_v0 }
  0x10   :  { %695 = vmatpush3.bf16.msra.mxu0 %v880_v13  ;;  %719 = vmatpush3.bf16.msra.mxu1 %v880_v13 }
  0x11   :  { %696 = vmatprep.subr.bf16.mxu0 %v817_v0  ;;  %720 = vmatprep.subr.bf16.mxu1 %v817_v0 }
  0x14   :  { %698 = vmatpush3.bf16.msra.mxu0 %v892_v16  ;;  %722 = vmatpush3.bf16.msra.mxu1 %v892_v16 }
  0x15   :  { %699 = vmatprep.subr.bf16.mxu0 %v817_v0  ;;  %723 = vmatprep.subr.bf16.mxu1 %v817_v0 }
  0x18   :  { %701 = vmatpush3.bf16.msra.mxu0 %v904_v19  ;;  %725 = vmatpush3.bf16.msra.mxu1 %v904_v19 }
  0x19   :  { %702 = vmatprep.subr.bf16.mxu0 %v817_v0  ;;  %726 = vmatprep.subr.bf16.mxu1 %v817_v0 }
  0x1c   :  { %704 = vmatpush3.bf16.msra.mxu0 %v916_v22  ;;  %728 = vmatpush3.bf16.msra.mxu1 %v916_v22 }
  0x1d   :  { %705 = vmatprep.subr.bf16.mxu0 %v817_v0  ;;  %729 = vmatprep.subr.bf16.mxu1 %v817_v0 }
  0x20   :  { %707 = vmatpush3.bf16.msra.mxu0 %v928_v25  ;;  %731 = vmatpush3.bf16.msra.mxu1 %v928_v25 }
  0x21   :  { %732 = vmatprep.subr.bf16.mxu0 %v817_v0  ;;  %756 = vmatprep.subr.bf16.mxu1 %v817_v0 }
  0x23   :  { %542 = vmatmul.mubr.f32.vlgmr.msra.gmra.mrb[0].mxu0 %v819_v4 }
  0x24   :  { %734 = vmatpush3.bf16.msra.mxu0 %v847_v5  ;;  %611 = vmatprep.mubr.msk.f32.mxu0 %vm818_vm0, %v819_v4 }
  0x25   :  { %735 = vmatprep.subr.bf16.mxu0 %v817_v0 }
  0x28   :  { %737 = vmatpush3.bf16.msra.mxu0 %v856_v7 }
  0x29   :  { %738 = vmatprep.subr.bf16.mxu0 %v817_v0 }
  0x2c   :  { %740 = vmatpush3.bf16.msra.mxu0 %v868_v10 }
  0x2d   :  { %741 = vmatprep.subr.bf16.mxu0 %v817_v0 }
  0x30   :  { %743 = vmatpush3.bf16.msra.mxu0 %v880_v13 }
  0x31   :  { %744 = vmatprep.subr.bf16.mxu0 %v817_v0 }
  0x34   :  { %746 = vmatpush3.bf16.msra.mxu0 %v892_v16 }
  0x35   :  { %747 = vmatprep.subr.bf16.mxu0 %v817_v0 }
  0x38   :  { %749 = vmatpush3.bf16.msra.mxu0 %v904_v19 }
  0x39   :  { %750 = vmatprep.subr.bf16.mxu0 %v817_v0 }
  0x3c   :  { %752 = vmatpush3.bf16.msra.mxu0 %v916_v22 }
  0x3d   :  { %753 = vmatprep.subr.bf16.mxu0 %v817_v0 }
  0x40   :  { %755 = vmatpush3.bf16.msra.mxu0 %v928_v25 }
  0x41   :  { %780 = vmatprep.subr.bf16.mxu0 %v817_v0 }
  0xf6   :  { %v100_v27 = vpop.f32.mrb[0].mxu0 }
  0xf7   :  { %v104_v28 = vadd.f32 %v100_v27, %v33_v26  ;;  %v543_v29 = vpop.f32.mrb[1].mxu0 }
  0xf9   :  { %807 = vtanh.f32 %v104_v28 }
 0x103   :  { %v808_v30 = vpop.eup %807 }
 0x104   :  { %106 = vst [vmem:[%s1022_s2] sm:$0xff] %v808_v30  ;;  %577 = vmatmul.mubr.f32.vlgmr.msra.gmra.mrb[0].mxu1 %v808_v30 }
 0x105   :  { %758 = vmatpush3.bf16.msra.mxu1 %v847_v5  ;;  %646 = vmatprep.mubr.msk.f32.mxu1 %vm818_vm0, %v819_v4 }
 0x106   :  { %759 = vmatprep.subr.bf16.mxu1 %v817_v0 }
 0x109   :  { %761 = vmatpush3.bf16.msra.mxu1 %v856_v7 }
 0x10a   :  { %762 = vmatprep.subr.bf16.mxu1 %v817_v0 }
 0x10d   :  { %764 = vmatpush3.bf16.msra.mxu1 %v868_v10 }
 0x10e   :  { %765 = vmatprep.subr.bf16.mxu1 %v817_v0 }
 0x111   :  { %767 = vmatpush3.bf16.msra.mxu1 %v880_v13 }
 0x112   :  { %768 = vmatprep.subr.bf16.mxu1 %v817_v0 }
 0x115   :  { %770 = vmatpush3.bf16.msra.mxu1 %v892_v16 }
 0x116   :  { %771 = vmatprep.subr.bf16.mxu1 %v817_v0 }
 0x119   :  { %773 = vmatpush3.bf16.msra.mxu1 %v904_v19 }
 0x11a   :  { %774 = vmatprep.subr.bf16.mxu1 %v817_v0 }
 0x11d   :  { %776 = vmatpush3.bf16.msra.mxu1 %v916_v22 }
 0x11e   :  { %777 = vmatprep.subr.bf16.mxu1 %v817_v0 }
 0x121   :  { %779 = vmatpush3.bf16.msra.mxu1 %v928_v25 }
 0x1d7   :  { %v175_v32 = vpop.f32.mrb[0].mxu1 }
 0x1d8   :  { %v179_v33 = vadd.f32 %v416_v31, %v175_v32  ;;  %v578_v34 = vpop.f32.mrb[1].mxu1 }
 0x1da   :  { %809 = vtanh.f32 %v179_v33 }
 0x1e4   :  { %v810_v35 = vpop.eup %809 }
 0x1e5   :  { %417 = vst [vmem:[%s1022_s2 + $0x8] sm:$0xff] %v810_v35  ;;  %612 = vmatmul.mubr.f32.vlgmr.msra.gmra.mrb[2].mxu0 %v810_v35 }
 0x1e6   :  { %782 = vmatpush3.bf16.msra.mxu0 %v847_v5  ;;  %681 = vmatprep.mubr.msk.f32.mxu0 %vm818_vm0, %v819_v4 }
 0x1e7   :  { %783 = vmatprep.subr.bf16.mxu0 %v817_v0 }
 0x1ea   :  { %785 = vmatpush3.bf16.msra.mxu0 %v856_v7 }
 0x1eb   :  { %786 = vmatprep.subr.bf16.mxu0 %v817_v0 }
 0x1ee   :  { %788 = vmatpush3.bf16.msra.mxu0 %v868_v10 }
 0x1ef   :  { %789 = vmatprep.subr.bf16.mxu0 %v817_v0 }
 0x1f2   :  { %791 = vmatpush3.bf16.msra.mxu0 %v880_v13 }
 0x1f3   :  { %792 = vmatprep.subr.bf16.mxu0 %v817_v0 }
 0x1f6   :  { %794 = vmatpush3.bf16.msra.mxu0 %v892_v16 }
 0x1f7   :  { %795 = vmatprep.subr.bf16.mxu0 %v817_v0 }
 0x1fa   :  { %797 = vmatpush3.bf16.msra.mxu0 %v904_v19 }
 0x1fb   :  { %798 = vmatprep.subr.bf16.mxu0 %v817_v0 }
 0x1fe   :  { %800 = vmatpush3.bf16.msra.mxu0 %v916_v22 }
 0x1ff   :  { %801 = vmatprep.subr.bf16.mxu0 %v817_v0 }
 0x202   :  { %803 = vmatpush3.bf16.msra.mxu0 %v928_v25 }
 0x2b8   :  { %v251_v37 = vpop.f32.mrb[2].mxu0 }
 0x2b9   :  { %v255_v38 = vadd.f32 %v418_v36, %v251_v37  ;;  %v613_v39 = vpop.f32.mrb[3].mxu0 }
 0x2bb   :  { %811 = vtanh.f32 %v255_v38 }
 0x2c5   :  { %v812_v40 = vpop.eup %811 }
 0x2c6   :  { %419 = vst [vmem:[%s1022_s2 + $0x10] sm:$0xff] %v812_v40  ;;  %647 = vmatmul.mubr.f32.vlgmr.msra.gmra.mrb[2].mxu1 %v812_v40 }
 0x399   :  { %v327_v42 = vpop.f32.mrb[2].mxu1 }
 0x39a   :  { %v331_v43 = vadd.f32 %v420_v41, %v327_v42  ;;  %v648_v44 = vpop.f32.mrb[3].mxu1 }
 0x39c   :  { %813 = vtanh.f32 %v331_v43 }
 0x3a6   :  { %v814_v45 = vpop.eup %813 }
 0x3a7   :  { %421 = vst [vmem:[%s1022_s2 + $0x18] sm:$0xff] %v814_v45  ;;  %682 = vmatmul.mubr.f32.vlgmr.msra.gmra.mrb[4].mxu0 %v814_v45 }
 0x47a   :  { %v403_v47 = vpop.f32.mrb[4].mxu0 }
 0x47b   :  { %v407_v48 = vadd.f32 %v422_v46, %v403_v47  ;;  %v683_v49 = vpop.f32.mrb[5].mxu0 }
 0x47d   :  { %815 = vtanh.f32 %v407_v48 }
 0x487   :  { %v816_v50 = vpop.eup %815 }
 0x488   :  { %423 = vst [vmem:[%s1022_s2 + $0x20] sm:$0xff] %v816_v50 }

</bundles_post_ra>
